<compile_context>
chip_gen: v5e
topology: v5e:2x2
jax: 0.10.0
libtpu: 0.0.40
codegen_flags: <defaults>
</compile_context>

<pallas_src>
import functools

import jax
import jax.numpy as jnp
import numpy as np
from jax.experimental import pallas as pl
from jax.experimental.pallas import tpu as pltpu


def _jacobian_kernel(xf_ref, w1bd_ref, w2g_ref, w1f_ref, j_ref, *, nens, nbatch):
    """Single gridless invocation; all operands VMEM-resident.

    xf_ref  : (B, E*NX)   inputs, ensemble axis folded into lanes
    w1bd_ref: (E*NX, E*H) block-diagonal first-layer weights
    w2g_ref : (NY, E*H)   W2 with (e,k) folded into the 128-wide K axis
    w1f_ref : (E*H, NXp)  W1 with (e,k) folded into K, N padded to lane width
    j_ref   : (B, NY, NXp) ensemble-mean Jacobian (lane-dense output)
    """
    inv_e = 1.0 / nens

    # Forward hidden activations, produced directly in (B, E*H) lane-flat
    # layout: one MXU matmul, no in-kernel relayout of the ensemble axis.
    h = jnp.tanh(jnp.dot(xf_ref[...], w1bd_ref[...],
                         preferred_element_type=jnp.float32))       # (B, E*H)
    s = 1.0 - h * h                                                 # (B, E*H)

    w2g = w2g_ref[...]                                              # (NY, E*H)
    w1f = w1f_ref[...]                                              # (E*H, NXp)

    # J[b, i, j] = (1/E) * sum_{ek} s[b, ek] * W2g[i, ek] * W1f[ek, j]
    # One (NY, E*H) @ (E*H, NXp) dot per batch row: K = E*H = 128 folds the
    # ensemble sum into the contraction (exactly one MXU K-granule on v5e).
    # B is tiny & static -> full unroll; stores are full unmasked 128-lane
    # blocks.  At production B this loop becomes a "parallel" grid axis.
    for b in range(nbatch):
        g_b = s[b:b + 1, :] * w2g                                   # (NY, E*H)
        j_ref[b] = (jnp.dot(g_b, w1f, preferred_element_type=jnp.float32)
                    * inv_e).astype(j_ref.dtype)


@jax.jit
def auto_diff_ensemble(y, x, w1, w2):
    """Pallas implementation of AutoDiffEnsemble.forward for the synthetic map.

    `y` is accepted to mirror the PyTorch signature; the kernel recomputes the
    needed intermediates (tanh activations) from x, w1, w2."""
    E, B, NX = x.shape
    _, _, H = w1.shape
    _, _, NY = w2.shape
    assert y.shape == (E, B, NY)

    K = E * H
    NXP = ((NX + 127) // 128) * 128          # lane-dense output width

    # ---- layout plumbing (pure transposes / zero-fill, no per-sample math) --
    xf = jnp.transpose(x, (1, 0, 2)).reshape(B, E * NX)             # (B, E*NX)
    # Block-diagonal W1 so the forward h lands directly in (B, E*H) layout.
    eye = jnp.eye(E, dtype=w1.dtype)
    w1bd = (eye[:, None, :, None] * w1[:, :, None, :]).reshape(E * NX, K)
    w2g = jnp.transpose(w2, (2, 0, 1)).reshape(NY, K)               # (NY, E*H)
    w1f = jnp.transpose(w1, (0, 2, 1)).reshape(K, NX)               # (E*H, NX)
    if NXP != NX:
        w1f = jnp.pad(w1f, ((0, 0), (0, NXP - NX)))                 # (E*H, NXP)

    flops = 2 * B * (E * NX) * K + 2 * B * NY * K * NXP
    bytes_accessed = 4 * (xf.size + w1bd.size + w2g.size + w1f.size
                          + B * NY * NXP)

    kernel = functools.partial(_jacobian_kernel, nens=E, nbatch=B)
    j_pad = pl.pallas_call(
        kernel,
        out_shape=jax.ShapeDtypeStruct((B, NY, NXP), jnp.float32),
        in_specs=[pl.BlockSpec(memory_space=pltpu.MemorySpace.VMEM)
                  for _ in range(4)],
        out_specs=pl.BlockSpec(memory_space=pltpu.MemorySpace.VMEM),
        cost_estimate=pl.CostEstimate(flops=flops,
                                      transcendentals=B * K,
                                      bytes_accessed=bytes_accessed),
    )(xf, w1bd, w2g, w1f)
    return j_pad[:, :, :NX]


def _reference(x, w1, w2):
    """Pure-JAX mirror of the PyTorch loop (VJP with basis cotangents,
    mean over ensemble dim, row-by-row assembly)."""
    E, B, NX = x.shape
    NY = w2.shape[-1]
    hp = jax.lax.Precision.HIGHEST

    def f(xx):
        h = jnp.tanh(jnp.einsum('ebn,enh->ebh', xx, w1, precision=hp))
        return jnp.einsum('ebh,ehy->eby', h, w2, precision=hp)

    y, vjp_fn = jax.vjp(f, x)
    rows = []
    for i in range(NY):
        v = jnp.zeros((E, B, NY), jnp.float32).at[:, :, i].set(1.0)
        (vJ,) = vjp_fn(v)                       # (E, B, NX)
        rows.append(jnp.mean(vJ, axis=0))       # (B, NX)  == J[:, i, :]
    J = jnp.stack(rows, axis=1)                 # (B, NY, NX)
    return y, J


if __name__ == "__main__":
    E, B, NX, H, NY = 4, 2, 16, 32, 8

    key = jax.random.PRNGKey(0)
    kx, k1, k2 = jax.random.split(key, 3)
    x = jax.random.normal(kx, (E, B, NX), jnp.float32)
    w1 = jax.random.normal(k1, (E, NX, H), jnp.float32) / jnp.sqrt(NX)
    w2 = jax.random.normal(k2, (E, H, NY), jnp.float32) / jnp.sqrt(H)

    # y produced by the synthetic forward map (the "graph" linking y to x)
    y_ref, J_ref = _reference(x, w1, w2)

    J = auto_diff_ensemble(y_ref, x, w1, w2)
    J = jax.block_until_ready(J)

    assert J.shape == (B, NY, NX) and J.dtype == jnp.float32
    np.testing.assert_allclose(np.asarray(J), np.asarray(J_ref),
                               rtol=1e-2, atol=1e-2)
    print("KERNEL_OK")
</pallas_src>

<mosaic_0001>
module attributes {stable_mosaic.version = 11 : i64} {
  func.func @_jacobian_kernel(%arg0: memref<2x64xf32, #tpu.memory_space<vmem>>, %arg1: memref<64x128xf32, #tpu.memory_space<vmem>>, %arg2: memref<8x128xf32, #tpu.memory_space<vmem>>, %arg3: memref<128x128xf32, #tpu.memory_space<vmem>>, %arg4: memref<2x8x128xf32, #tpu.memory_space<vmem>>) attributes {dimension_semantics = [], scalar_prefetch = 0 : i64, scratch_operands = 0 : i64, tpu.core_type = #tpu.core_type<tc>} {
    %c0 = arith.constant 0 : index
    %c0_0 = arith.constant 0 : index
    %0 = vector.load %arg0[%c0, %c0_0] : memref<2x64xf32, #tpu.memory_space<vmem>>, vector<2x64xf32>
    %c0_1 = arith.constant 0 : index
    %c0_2 = arith.constant 0 : index
    %1 = vector.load %arg1[%c0_1, %c0_2] : memref<64x128xf32, #tpu.memory_space<vmem>>, vector<64x128xf32>
    %cst = arith.constant dense<0.000000e+00> : vector<2x128xf32>
    %2 = tpu.matmul %0, %1, %cst {dimension_numbers = #tpu.dot_dimension_numbers<[1], [0], [0], [1], [0, 0, 1, 1], [], []>} : vector<2x64xf32>, vector<64x128xf32>, vector<2x128xf32> -> vector<2x128xf32>
    %3 = math.tanh %2 : vector<2x128xf32>
    %4 = arith.mulf %3, %3 : vector<2x128xf32>
    %cst_3 = arith.constant 1.000000e+00 : f32
    %5 = vector.broadcast %cst_3 : f32 to vector<2x128xf32>
    %6 = arith.subf %5, %4 : vector<2x128xf32>
    %c0_4 = arith.constant 0 : index
    %c0_5 = arith.constant 0 : index
    %7 = vector.load %arg2[%c0_4, %c0_5] : memref<8x128xf32, #tpu.memory_space<vmem>>, vector<8x128xf32>
    %c0_6 = arith.constant 0 : index
    %c0_7 = arith.constant 0 : index
    %8 = vector.load %arg3[%c0_6, %c0_7] : memref<128x128xf32, #tpu.memory_space<vmem>>, vector<128x128xf32>
    %9 = vector.extract_strided_slice %6 {offsets = [0, 0], sizes = [1, 128], strides = [1, 1]} : vector<2x128xf32> to vector<1x128xf32>
    %10 = vector.broadcast %9 : vector<1x128xf32> to vector<8x128xf32>
    %11 = arith.mulf %10, %7 : vector<8x128xf32>
    %cst_8 = arith.constant dense<0.000000e+00> : vector<8x128xf32>
    %12 = tpu.matmul %11, %8, %cst_8 {dimension_numbers = #tpu.dot_dimension_numbers<[1], [0], [0], [1], [0, 0, 1, 1], [], []>} : vector<8x128xf32>, vector<128x128xf32>, vector<8x128xf32> -> vector<8x128xf32>
    %cst_9 = arith.constant 2.500000e-01 : f32
    %13 = vector.broadcast %cst_9 : f32 to vector<8x128xf32>
    %14 = arith.mulf %12, %13 : vector<8x128xf32>
    %c0_10 = arith.constant 0 : index
    %c0_11 = arith.constant 0 : index
    %c0_12 = arith.constant 0 : index
    %15 = vector.load %arg4[%c0_10, %c0_11, %c0_12] : memref<2x8x128xf32, #tpu.memory_space<vmem>>, vector<1x8x128xf32>
    %16 = vector.shape_cast %15 : vector<1x8x128xf32> to vector<8x128xf32>
    %17 = vector.shape_cast %14 : vector<8x128xf32> to vector<1x8x128xf32>
    tpu.vector_store %arg4[%c0_10, %c0_11, %c0_12], %17 {strides = array<i32>} : memref<2x8x128xf32, #tpu.memory_space<vmem>>, vector<1x8x128xf32>,
    %18 = vector.extract_strided_slice %6 {offsets = [1, 0], sizes = [1, 128], strides = [1, 1]} : vector<2x128xf32> to vector<1x128xf32>
    %19 = vector.broadcast %18 : vector<1x128xf32> to vector<8x128xf32>
    %20 = arith.mulf %19, %7 : vector<8x128xf32>
    %cst_13 = arith.constant dense<0.000000e+00> : vector<8x128xf32>
    %21 = tpu.matmul %20, %8, %cst_13 {dimension_numbers = #tpu.dot_dimension_numbers<[1], [0], [0], [1], [0, 0, 1, 1], [], []>} : vector<8x128xf32>, vector<128x128xf32>, vector<8x128xf32> -> vector<8x128xf32>
    %cst_14 = arith.constant 2.500000e-01 : f32
    %22 = vector.broadcast %cst_14 : f32 to vector<8x128xf32>
    %23 = arith.mulf %21, %22 : vector<8x128xf32>
    %c1 = arith.constant 1 : index
    %c0_15 = arith.constant 0 : index
    %c0_16 = arith.constant 0 : index
    %24 = vector.load %arg4[%c1, %c0_15, %c0_16] : memref<2x8x128xf32, #tpu.memory_space<vmem>>, vector<1x8x128xf32>
    %25 = vector.shape_cast %24 : vector<1x8x128xf32> to vector<8x128xf32>
    %26 = vector.shape_cast %23 : vector<8x128xf32> to vector<1x8x128xf32>
    tpu.vector_store %arg4[%c1, %c0_15, %c0_16], %26 {strides = array<i32>} : memref<2x8x128xf32, #tpu.memory_space<vmem>>, vector<1x8x128xf32>,
    return
  }
}

</mosaic_0001>

<bundles_post_ra>
// kernel: auto_diff_ensemble.1
= control target key start
LH: loop header
LB: loop body
LE: loop exit
PB: predicated region body
PF: predicated region fallthrough
CT: control target
= control target key end

     0   :  { %s279_s0 = inlined_call_operand.vmem [shape: f32[2,64], index: 0, kind: input, shape index: {}]   ;;  %s280_s1 = inlined_call_operand.vmem [shape: f32[64,128], index: 1, kind: input, shape index: {}]   ;;  %s281_s2 = inlined_call_operand.vmem [shape: f32[8,128], index: 2, kind: input, shape index: {}]   ;;  %s282_s3 = inlined_call_operand.vmem [shape: f32[128,128], index: 3, kind: input, shape index: {}]   ;;  %s283_s4 = inlined_call_operand.hbm [shape: f32[2,8,128], index: 4, kind: output, shape index: {}]  }
   0x1   :  { %v26_v0 = vld [vmem:[%s280_s1 + $0x38] sm:$0xff]  ;;  %v25_v1 = vld [vmem:[%s280_s1 + $0x30] sm:$0xff]  ;;  %v24_v2 = vld [vmem:[%s280_s1 + $0x28] sm:$0xff] }
   0x2   :  { %39 = vmatpush.msra.mxu0 %v26_v0  ;;  %v70_v3 = vld [vmem:[%s282_s3 + $0x78] sm:$0xff]  ;;  %v69_v4 = vld [vmem:[%s282_s3 + $0x70] sm:$0xff]  ;;  %v23_v5 = vld [vmem:[%s280_s1 + $0x20] sm:$0xff] }
   0x3   :  { %73 = vmatpush.msra.mxu1 %v70_v3  ;;  %97 = vmatpush.msra.mxu2 %v70_v3  ;;  %v68_v6 = vld [vmem:[%s282_s3 + $0x68] sm:$0xff] }
   0x4   :  { %40 = vmatpush.msra.mxu0 %v25_v1 }
   0x6   :  { %41 = vmatpush.msra.mxu0 %v24_v2 }
   0x7   :  { %9 = vsyncpa [#allocation3], 0  ;;  %v22_v7 = vld [vmem:[%s280_s1 + $0x18] sm:$0xff]  ;;  %74 = vmatpush.msra.mxu1 %v69_v4  ;;  %98 = vmatpush.msra.mxu2 %v69_v4  ;;  %v67_v8 = vld [vmem:[%s282_s3 + $0x60] sm:$0xff]  ;;  %vm27_vm0 = vcmask 523264   ;;  %s126_s16 = sshll.u32 %s283_s4, 4  ;;  %s127_s16 = int_to_ptr.hbm [resolvable:$true] %s126_s16 }
   0x8   :  { %42 = vmatpush.msra.mxu0 %v23_v5  ;;  %v21_v9 = vld [vmem:[%s280_s1 + $0x10] sm:$0xff]  ;;  %v66_v10 = vld [vmem:[%s282_s3 + $0x58] sm:$0xff]  ;;  %v20_v11 = vld [vmem:[%s280_s1 + $0x8] sm:$0xff]  ;;  %s172_s17 = smov 8  }
   0x9   :  { %75 = vmatpush.msra.mxu1 %v68_v6  ;;  %99 = vmatpush.msra.mxu2 %v68_v6  ;;  %v65_v12 = vld [vmem:[%s282_s3 + $0x50] sm:$0xff]  ;;  %v19_v13 = vld [vmem:[%s280_s1] sm:$0xff]  ;;  %v64_v15 = vld [vmem:[%s282_s3 + $0x48] sm:$0xff] }
   0xa   :  { %43 = vmatpush.msra.mxu0 %v22_v7  ;;  %v18_v14 = vld [vmem:[%s279_s0] sm:$0x3]  ;;  %v62_v17 = vld [vmem:[%s282_s3 + $0x38] sm:$0xff]  ;;  %v61_v18 = vld [vmem:[%s282_s3 + $0x30] sm:$0xff] }
   0xb   :  { %76 = vmatpush.msra.mxu1 %v67_v8  ;;  %100 = vmatpush.msra.mxu2 %v67_v8  ;;  %v63_v16 = vld [vmem:[%s282_s3 + $0x40] sm:$0xff]  ;;  %v60_v19 = vld [vmem:[%s282_s3 + $0x28] sm:$0xff]  ;;  %v58_v21 = vld [vmem:[%s282_s3 + $0x18] sm:$0xff] }
   0xc   :  { %44 = vmatpush.msra.mxu0 %v21_v9  ;;  %v59_v20 = vld [vmem:[%s282_s3 + $0x20] sm:$0xff]  ;;  %v57_v22 = vld [vmem:[%s282_s3 + $0x10] sm:$0xff]  ;;  %v56_v23 = vld [vmem:[%s282_s3 + $0x8] sm:$0xff] }
   0xd   :  { %77 = vmatpush.msra.mxu1 %v66_v10  ;;  %101 = vmatpush.msra.mxu2 %v66_v10  ;;  %v55_v24 = vld [vmem:[%s282_s3] sm:$0xff]  ;;  %s170_s3 = smov [#allocation2]  }
   0xe   :  { %45 = vmatpush.msra.mxu0 %v20_v11  ;;  %v54_v29 = vld [vmem:[%s281_s2] sm:$0xff]  ;;  %s124_s13 = sshll.u32 %s170_s3, 4  ;;  %s171_s2 = smov 128   ;;  %s125_s13 = int_to_ptr.vmem [resolvable:$true] %s124_s13 }
   0xf   :  { %78 = vmatpush.msra.mxu1 %v65_v12  ;;  %102 = vmatpush.msra.mxu2 %v65_v12 }
  0x10   :  { %46 = vmatpush.msra.mxu0 %v19_v13 }
  0x11   :  { %138 = vmatmul.msk.f32.vlgmr.msra.gmra.mxu0 %vm27_vm0, %v18_v14  ;;  %79 = vmatpush.msra.mxu1 %v64_v15 }
  0x12   :  { %103 = vmatpush.msra.mxu2 %v64_v15 }
  0x13   :  { %80 = vmatpush.msra.mxu1 %v63_v16 }
  0x14   :  { %104 = vmatpush.msra.mxu2 %v63_v16 }
  0x15   :  { %81 = vmatpush.msra.mxu1 %v62_v17 }
  0x16   :  { %105 = vmatpush.msra.mxu2 %v62_v17 }
  0x17   :  { %82 = vmatpush.msra.mxu1 %v61_v18 }
  0x18   :  { %106 = vmatpush.msra.mxu2 %v61_v18 }
  0x19   :  { %83 = vmatpush.msra.mxu1 %v60_v19 }
  0x1a   :  { %107 = vmatpush.msra.mxu2 %v60_v19 }
  0x1b   :  { %84 = vmatpush.msra.mxu1 %v59_v20 }
  0x1c   :  { %108 = vmatpush.msra.mxu2 %v59_v20 }
  0x1d   :  { %85 = vmatpush.msra.mxu1 %v58_v21 }
  0x1e   :  { %109 = vmatpush.msra.mxu2 %v58_v21 }
  0x1f   :  { %86 = vmatpush.msra.mxu1 %v57_v22 }
  0x20   :  { %110 = vmatpush.msra.mxu2 %v57_v22 }
  0x21   :  { %87 = vmatpush.msra.mxu1 %v56_v23 }
  0x22   :  { %111 = vmatpush.msra.mxu2 %v56_v23 }
  0x23   :  { %88 = vmatpush.msra.mxu1 %v55_v24 }
  0x24   :  { %112 = vmatpush.msra.mxu2 %v55_v24 }
  0x8e   :  { %v48_v25 = vpop.f32.mrf.mxu0 }
  0x8f   :  { %142 = vtanh.f32 %v48_v25 }
  0x95   :  { %v143_v26 = vpop.eup %142 }
  0x96   :  { %v52_v27 = vmul.f32 %v143_v26, %v143_v26 }
  0x98   :  { %v53_v28 = vsub.f32 1.0, %v52_v27 }
  0x9a   :  { %v71_v30 = vperm.slane %v53_v28, 0  ;;  %v95_v31 = vperm.slane %v53_v28, 1 }
  0x9c   :  { %v72_v32 = vmul.f32 %v71_v30, %v54_v29  ;;  %v96_v33 = vmul.f32 %v95_v31, %v54_v29 }
  0x9e   :  { %89 = vmatmul.f32.vlgmr.msra.gmra.mxu1 %v72_v32  ;;  %113 = vmatmul.f32.vlgmr.msra.gmra.mxu2 %v96_v33 }
 0x11b   :  { %v90_v34 = vpop.f32.mrf.mxu1 }
 0x11c   :  { %v93_v35 = vmul.f32 0.25, %v90_v34 }
 0x11e   :  { %94 = vst [vmem:[#allocation2] sm:$0xff] %v93_v35 }
 0x121   :  { %v114_v36 = vpop.f32.mrf.mxu2 }
 0x122   :  { %v117_v37 = vmul.f32 0.25, %v114_v36 }
 0x124   :  { %119 = vst [vmem:[#allocation2 + $0x8] sm:$0xff] %v117_v37 }
 0x125   :  { %132 = dma.vmem_to_hbm [thread:$0]  %s125_s13, 256, %s127_s16, [#allocation3], %s171_s2, %s171_s2, %s172_s17  }
 0x126   :  { %168 = dma.done.wait [#allocation3], 256  }
 0x127   :  { %169 = vsyncadd [#allocation3], 4294967040 }
 0x128   :  { %137 = vsyncpa [#allocation3], 1 }

</bundles_post_ra>
